<compile_context>
chip_gen: v6e
topology: v6e:2x2x1
jax: 0.10.0
libtpu: 0.0.40
codegen_flags: <defaults>
</compile_context>

<pallas_src>
import functools

import jax
import jax.numpy as jnp
from jax import lax
from jax.experimental import pallas as pl
from jax.experimental.pallas import tpu as pltpu

SMOOTH = 1e-5
LANE = 128


def _dice_partial_kernel(x_ref, lbl_ref, part_ref, acc_int, acc_y, acc_t, *,
                         hw, rows_per_tile, num_classes, softmax, needs_mask):
    """Accumulate per-class (intersect, sum p^2, sum t) over pixel tiles.

    x_ref:   (C, T, 128)  probabilities or logits (native dtype, cast here)
    lbl_ref: (1, T, 128)  integer class labels
    part_ref:(C, 3)       per-batch-element partial sums, written at last tile
    acc_*:   (C, 1, 128)  lane-dense running sums (VMEM scratch)
    """
    k = pl.program_id(1)
    C = num_classes
    T = rows_per_tile

    @pl.when(k == 0)
    def _():
        acc_int[...] = jnp.zeros_like(acc_int)
        acc_y[...] = jnp.zeros_like(acc_y)
        acc_t[...] = jnp.zeros_like(acc_t)

    x = x_ref[...].astype(jnp.float32)                       # (C, T, 128)

    if needs_mask:
        # Only emitted when the pixel range does not tile exactly: mask the
        # (possibly OOB / padded) tail — OOB block contents are undefined.
        row = k * T + lax.broadcasted_iota(jnp.int32, (1, T, LANE), 1)
        lane = lax.broadcasted_iota(jnp.int32, (1, T, LANE), 2)
        valid = (row * LANE + lane) < hw                     # (1, T, 128) bool
        x = jnp.where(valid, x, 0.0)                         # keep numerics finite

    if softmax:  # static flag: fused per-pixel softmax over the class axis
        m = jnp.max(x, axis=0, keepdims=True)                # (1,T,128) VPU (major axis)
        e = jnp.exp(x - m)                                   # EUP
        denom = jnp.sum(e, axis=0, keepdims=True)
        x = e * pl.reciprocal(denom, approx=True)            # EUP recip + VPU mul
        if needs_mask:
            x = jnp.where(valid, x, 0.0)                     # invalid lanes were 1/C

    lbl = lbl_ref[...].astype(jnp.int32)                     # (1, T, 128)
    if needs_mask:
        lbl = jnp.where(valid, lbl, -1)                      # no class matches

    # One-hot target via C scalar compares (no class iota, no XLU broadcast).
    t_stat = jnp.concatenate(
        [(lbl == c).astype(jnp.float32) for c in range(C)], axis=0)  # (C,T,128)

    # Lane-dense partial sums; the cross-lane reduce is deferred to the end.
    acc_int[...] += jnp.sum(x * t_stat, axis=1, keepdims=True)
    acc_y[...] += jnp.sum(x * x, axis=1, keepdims=True)
    acc_t[...] += jnp.sum(t_stat, axis=1, keepdims=True)

    @pl.when(k == pl.num_programs(1) - 1)
    def _():
        def _collapse(acc):                                  # (C,1,128) -> (C,1)
            return jnp.sum(acc, axis=2)
        part_ref[:, 0:1] = _collapse(acc_int[...])
        part_ref[:, 1:2] = _collapse(acc_y[...])
        part_ref[:, 2:3] = _collapse(acc_t[...])


@functools.partial(jax.jit, static_argnames=("num_classes", "softmax", "tile"))
def dice_loss(inputs, target, num_classes, weight=None, softmax=False,
              tile=65536):
    """Pallas implementation of DiceLoss.forward.

    inputs: (N, C, H, W) float (any float dtype; cast in-kernel),
    target: (N, H, W) integer class labels in [0, C).
    Returns scalar loss = (sum_c w_c * dice_c) / C, as in the PyTorch module.
    """
    N, C, H, W = inputs.shape
    assert C == num_classes, "channel dim must equal num_classes"
    hw = H * W

    # Labels: keep int8/uint8 unwidened (widened in-kernel).  Anything else is
    # cast to int32 (no wrapper-side narrowing — that costs an extra HBM pass).
    if target.dtype in (jnp.dtype(jnp.int8), jnp.dtype(jnp.uint8)):
        lbl = target
    else:
        lbl = target.astype(jnp.int32)

    x = inputs.reshape(N, C, hw)
    lbl = lbl.reshape(N, 1, hw)

    S = pl.cdiv(hw, LANE)                     # number of 128-pixel rows
    pad = S * LANE - hw
    if pad:
        # TODO(synk): H*W not a multiple of 128 costs one extra HBM pass here
        # (pad copy); a BoundedSlice tail path would avoid it.
        x = jnp.pad(x, ((0, 0), (0, 0), (0, pad)))
        lbl = jnp.pad(lbl, ((0, 0), (0, 0), (0, pad)))
    x = x.reshape(N, C, S, LANE)              # free reshape in the common case
    lbl = lbl.reshape(N, 1, S, LANE)

    # Tile selection: as many 128-pixel rows per grid step as the VMEM budget
    # allows (double-buffered input blocks <= ~8 MiB: fits v5e's 16 MiB scoped
    # default and v7x's 64 MiB physical VMEM), amortizing the ~0.35 us
    # per-grid-step overhead.
    x_item = jnp.dtype(inputs.dtype).itemsize
    l_item = jnp.dtype(lbl.dtype).itemsize
    budget = 8 * 1024 * 1024
    bytes_per_row = LANE * (C * x_item + l_item)
    max_rows = max(8, budget // (2 * bytes_per_row))
    row_mult = max(32 // x_item, 32 // l_item, 8)   # native sublane tiling
    T = min(max(tile // LANE, row_mult), max_rows)
    if T >= S:
        T, num_k = S, 1
    else:
        T = max(row_mult, (T // row_mult) * row_mult)
        num_k = pl.cdiv(S, T)

    needs_mask = bool(pad) or (num_k * T != S)

    kernel = functools.partial(
        _dice_partial_kernel, hw=hw, rows_per_tile=T, num_classes=C,
        softmax=softmax, needs_mask=needs_mask)

    partials = pl.pallas_call(
        kernel,
        out_shape=jax.ShapeDtypeStruct((N, C, 3), jnp.float32),
        grid_spec=pltpu.PrefetchScalarGridSpec(
            num_scalar_prefetch=0,
            grid=(N, num_k),   # batch parallel (megacore), pixel tiles reduced
            in_specs=[
                pl.BlockSpec((None, C, T, LANE), lambda n, k: (n, 0, k, 0)),
                pl.BlockSpec((None, 1, T, LANE), lambda n, k: (n, 0, k, 0)),
            ],
            out_specs=pl.BlockSpec((None, C, 3), lambda n, k: (n, 0, 0)),
            scratch_shapes=[pltpu.VMEM((C, 1, LANE), jnp.float32)
                            for _ in range(3)],
        ),
        compiler_params=pltpu.CompilerParams(
            dimension_semantics=("parallel", "arbitrary"),
            vmem_limit_bytes=32 * 1024 * 1024),
    )(x, lbl)
    # TODO(synk): on v7x, add a second "parallel" grid axis that splits the
    # pixel range so both TensorCores stay busy when N == 1.

    # Tiny per-class combine (N*C*3 floats) in plain JAX.
    if weight is None:
        w = jnp.ones((num_classes,), jnp.float32)
    else:
        w = jnp.asarray(weight, jnp.float32).reshape(num_classes)
    tot = jnp.sum(partials, axis=0)                          # (C, 3)
    inter, y_sum, gt_sum = tot[:, 0], tot[:, 1], tot[:, 2]
    dice = (2.0 * inter + SMOOTH) / (y_sum + gt_sum + SMOOTH)
    return jnp.sum(dice * w) / num_classes


def _ref_dice_loss(inputs, target, num_classes, weight=None, softmax=False):
    """Pure-JAX reference mirroring the PyTorch module."""
    if softmax:
        inputs = jax.nn.softmax(inputs, axis=1)
    if weight is None:
        weight = [1.0] * num_classes
    tgt = jax.nn.one_hot(target, num_classes, axis=1, dtype=jnp.float32)
    loss = 0.0
    for i in range(num_classes):
        s = inputs[:, i]
        t = tgt[:, i]
        inter = jnp.sum(s * t)
        y_sum = jnp.sum(s * s)
        gt_sum = jnp.sum(t * t)
        dice = (2.0 * inter + SMOOTH) / (y_sum + gt_sum + SMOOTH)
        loss = loss + dice * weight[i]
    return loss / num_classes


if __name__ == "__main__":
    N, C, H, W = 2, 4, 16, 16
    key = jax.random.PRNGKey(0)
    k1, k2 = jax.random.split(key)
    logits = jax.random.normal(k1, (N, C, H, W), dtype=jnp.float32)
    target = jax.random.randint(k2, (N, H, W), 0, C, dtype=jnp.int32)

    # 1) Fused-softmax path (single tile, no tail mask).
    loss_sm = jax.block_until_ready(
        dice_loss(logits, target, num_classes=C, softmax=True))
    ref_sm = _ref_dice_loss(logits, target, num_classes=C, softmax=True)
    assert jnp.allclose(loss_sm, ref_sm, rtol=1e-4, atol=1e-5), (
        float(loss_sm), float(ref_sm))

    # 2) Pre-normalized probabilities + non-trivial class weights.
    probs = jax.nn.softmax(logits, axis=1)
    wts = [0.5, 1.0, 1.5, 2.0]
    loss_p = jax.block_until_ready(
        dice_loss(probs, target, num_classes=C, weight=wts, softmax=False))
    ref_p = _ref_dice_loss(probs, target, num_classes=C, weight=wts,
                           softmax=False)
    assert jnp.allclose(loss_p, ref_p, rtol=1e-4, atol=1e-5), (
        float(loss_p), float(ref_p))

    # 3) Multi-tile accumulation path (small tile forces several grid steps).
    C2 = 3
    k3, k4 = jax.random.split(k1)
    logits2 = jax.random.normal(k3, (1, C2, 64, 64), dtype=jnp.float32)
    target2 = jax.random.randint(k4, (1, 64, 64), 0, C2, dtype=jnp.int32)
    loss_mt = jax.block_until_ready(
        dice_loss(logits2, target2, num_classes=C2, softmax=True, tile=1024))
    ref_mt = _ref_dice_loss(logits2, target2, num_classes=C2, softmax=True)
    assert jnp.allclose(loss_mt, ref_mt, rtol=1e-4, atol=1e-5), (
        float(loss_mt), float(ref_mt))

    # 4) Masked-tail path (H*W not a multiple of 128).
    k5, k6 = jax.random.split(k2)
    logits3 = jax.random.normal(k5, (1, C2, 63, 64), dtype=jnp.float32)
    target3 = jax.random.randint(k6, (1, 63, 64), 0, C2, dtype=jnp.int32)
    loss_msk = jax.block_until_ready(
        dice_loss(logits3, target3, num_classes=C2, softmax=True, tile=1024))
    ref_msk = _ref_dice_loss(logits3, target3, num_classes=C2, softmax=True)
    assert jnp.allclose(loss_msk, ref_msk, rtol=1e-4, atol=1e-5), (
        float(loss_msk), float(ref_msk))

    print("KERNEL_OK")
</pallas_src>

<mosaic_0001>
module attributes {stable_mosaic.version = 11 : i64} {
  func.func @_dice_partial_kernel(%arg0: i32, %arg1: i32, %arg2: memref<1x4x2x128xf32, #tpu.memory_space<vmem>>, %arg3: memref<1x1x2x128xi32, #tpu.memory_space<vmem>>, %arg4: memref<1x4x3xf32, #tpu.memory_space<vmem>>, %arg5: memref<4x1x128xf32, #tpu.memory_space<vmem>>, %arg6: memref<4x1x128xf32, #tpu.memory_space<vmem>>, %arg7: memref<4x1x128xf32, #tpu.memory_space<vmem>>) attributes {dimension_semantics = [#tpu.dimension_semantics<parallel>, #tpu.dimension_semantics<arbitrary>], iteration_bounds = array<i64: 2, 1>, scalar_prefetch = 0 : i64, scratch_operands = 3 : i64, tpu.core_type = #tpu.core_type<tc>, window_params = [{transform_indices = @transform_0, window_bounds = array<i64: 1, 4, 2, 128>}, {transform_indices = @transform_1, window_bounds = array<i64: 1, 1, 2, 128>}, {transform_indices = @transform_2, window_bounds = array<i64: 1, 4, 3>}]} {
    %c0_i32 = arith.constant 0 : i32
    %0 = arith.cmpi eq, %arg1, %c0_i32 : i32
    %1 = arith.extui %0 : i1 to i32
    %c0_i32_0 = arith.constant 0 : i32
    %2 = arith.cmpi ne, %1, %c0_i32_0 : i32
    scf.if %2 {
      %cst_33 = arith.constant 0.000000e+00 : f32
      %54 = vector.broadcast %cst_33 : f32 to vector<4x1x128xf32>
      %c0_34 = arith.constant 0 : index
      %c0_35 = arith.constant 0 : index
      %c0_36 = arith.constant 0 : index
      %55 = vector.load %arg5[%c0_34, %c0_35, %c0_36] : memref<4x1x128xf32, #tpu.memory_space<vmem>>, vector<4x1x128xf32>
      tpu.vector_store %arg5[%c0_34, %c0_35, %c0_36], %54 {strides = array<i32>} : memref<4x1x128xf32, #tpu.memory_space<vmem>>, vector<4x1x128xf32>,
      %cst_37 = arith.constant 0.000000e+00 : f32
      %56 = vector.broadcast %cst_37 : f32 to vector<4x1x128xf32>
      %c0_38 = arith.constant 0 : index
      %c0_39 = arith.constant 0 : index
      %c0_40 = arith.constant 0 : index
      %57 = vector.load %arg6[%c0_38, %c0_39, %c0_40] : memref<4x1x128xf32, #tpu.memory_space<vmem>>, vector<4x1x128xf32>
      tpu.vector_store %arg6[%c0_38, %c0_39, %c0_40], %56 {strides = array<i32>} : memref<4x1x128xf32, #tpu.memory_space<vmem>>, vector<4x1x128xf32>,
      %cst_41 = arith.constant 0.000000e+00 : f32
      %58 = vector.broadcast %cst_41 : f32 to vector<4x1x128xf32>
      %c0_42 = arith.constant 0 : index
      %c0_43 = arith.constant 0 : index
      %c0_44 = arith.constant 0 : index
      %59 = vector.load %arg7[%c0_42, %c0_43, %c0_44] : memref<4x1x128xf32, #tpu.memory_space<vmem>>, vector<4x1x128xf32>
      tpu.vector_store %arg7[%c0_42, %c0_43, %c0_44], %58 {strides = array<i32>} : memref<4x1x128xf32, #tpu.memory_space<vmem>>, vector<4x1x128xf32>,
    } else {
    }
    %c0 = arith.constant 0 : index
    %c0_1 = arith.constant 0 : index
    %c0_2 = arith.constant 0 : index
    %c0_3 = arith.constant 0 : index
    %3 = vector.load %arg2[%c0, %c0_1, %c0_2, %c0_3] : memref<1x4x2x128xf32, #tpu.memory_space<vmem>>, vector<1x4x2x128xf32>
    %4 = vector.shape_cast %3 : vector<1x4x2x128xf32> to vector<4x2x128xf32>
    %cst = arith.constant dense<0xFF800000> : vector<2x128xf32>
    %5 = vector.multi_reduction <maximumf>, %4, %cst [0] : vector<4x2x128xf32> to vector<2x128xf32>
    %6 = vector.shape_cast %5 : vector<2x128xf32> to vector<1x2x128xf32>
    %7 = vector.broadcast %6 : vector<1x2x128xf32> to vector<4x2x128xf32>
    %8 = arith.subf %4, %7 : vector<4x2x128xf32>
    %9 = math.exp %8 : vector<4x2x128xf32>
    %cst_4 = arith.constant dense<0.000000e+00> : vector<2x128xf32>
    %10 = vector.multi_reduction <add>, %9, %cst_4 [0] : vector<4x2x128xf32> to vector<2x128xf32>
    %11 = vector.shape_cast %10 : vector<2x128xf32> to vector<1x2x128xf32>
    %12 = tpu.reciprocal %11 {approx = true} : vector<1x2x128xf32> -> vector<1x2x128xf32>
    %13 = vector.broadcast %12 : vector<1x2x128xf32> to vector<4x2x128xf32>
    %14 = arith.mulf %9, %13 : vector<4x2x128xf32>
    %c0_5 = arith.constant 0 : index
    %c0_6 = arith.constant 0 : index
    %c0_7 = arith.constant 0 : index
    %c0_8 = arith.constant 0 : index
    %15 = vector.load %arg3[%c0_5, %c0_6, %c0_7, %c0_8] : memref<1x1x2x128xi32, #tpu.memory_space<vmem>>, vector<1x1x2x128xi32>
    %16 = vector.shape_cast %15 : vector<1x1x2x128xi32> to vector<1x2x128xi32>
    %c0_i32_9 = arith.constant 0 : i32
    %17 = vector.broadcast %c0_i32_9 : i32 to vector<1x2x128xi32>
    %18 = arith.cmpi eq, %16, %17 : vector<1x2x128xi32>
    %19 = arith.extui %18 : vector<1x2x128xi1> to vector<1x2x128xi32>
    %20 = arith.sitofp %19 : vector<1x2x128xi32> to vector<1x2x128xf32>
    %c1_i32 = arith.constant 1 : i32
    %21 = vector.broadcast %c1_i32 : i32 to vector<1x2x128xi32>
    %22 = arith.cmpi eq, %16, %21 : vector<1x2x128xi32>
    %23 = arith.extui %22 : vector<1x2x128xi1> to vector<1x2x128xi32>
    %24 = arith.sitofp %23 : vector<1x2x128xi32> to vector<1x2x128xf32>
    %c2_i32 = arith.constant 2 : i32
    %25 = vector.broadcast %c2_i32 : i32 to vector<1x2x128xi32>
    %26 = arith.cmpi eq, %16, %25 : vector<1x2x128xi32>
    %27 = arith.extui %26 : vector<1x2x128xi1> to vector<1x2x128xi32>
    %28 = arith.sitofp %27 : vector<1x2x128xi32> to vector<1x2x128xf32>
    %c3_i32 = arith.constant 3 : i32
    %29 = vector.broadcast %c3_i32 : i32 to vector<1x2x128xi32>
    %30 = arith.cmpi eq, %16, %29 : vector<1x2x128xi32>
    %31 = arith.extui %30 : vector<1x2x128xi1> to vector<1x2x128xi32>
    %32 = arith.sitofp %31 : vector<1x2x128xi32> to vector<1x2x128xf32>
    %33 = tpu.concatenate %20, %24, %28, %32 in 0 : vector<1x2x128xf32>, vector<1x2x128xf32>, vector<1x2x128xf32>, vector<1x2x128xf32> -> vector<4x2x128xf32>
    %c0_10 = arith.constant 0 : index
    %c0_11 = arith.constant 0 : index
    %c0_12 = arith.constant 0 : index
    %34 = vector.load %arg5[%c0_10, %c0_11, %c0_12] : memref<4x1x128xf32, #tpu.memory_space<vmem>>, vector<4x1x128xf32>
    %35 = arith.mulf %14, %33 : vector<4x2x128xf32>
    %cst_13 = arith.constant dense<0.000000e+00> : vector<4x128xf32>
    %36 = vector.multi_reduction <add>, %35, %cst_13 [1] : vector<4x2x128xf32> to vector<4x128xf32>
    %37 = vector.shape_cast %36 : vector<4x128xf32> to vector<4x1x128xf32>
    %38 = arith.addf %34, %37 : vector<4x1x128xf32>
    %c0_14 = arith.constant 0 : index
    %c0_15 = arith.constant 0 : index
    %c0_16 = arith.constant 0 : index
    %39 = vector.load %arg5[%c0_14, %c0_15, %c0_16] : memref<4x1x128xf32, #tpu.memory_space<vmem>>, vector<4x1x128xf32>
    tpu.vector_store %arg5[%c0_14, %c0_15, %c0_16], %38 {strides = array<i32>} : memref<4x1x128xf32, #tpu.memory_space<vmem>>, vector<4x1x128xf32>,
    %c0_17 = arith.constant 0 : index
    %c0_18 = arith.constant 0 : index
    %c0_19 = arith.constant 0 : index
    %40 = vector.load %arg6[%c0_17, %c0_18, %c0_19] : memref<4x1x128xf32, #tpu.memory_space<vmem>>, vector<4x1x128xf32>
    %41 = arith.mulf %14, %14 : vector<4x2x128xf32>
    %cst_20 = arith.constant dense<0.000000e+00> : vector<4x128xf32>
    %42 = vector.multi_reduction <add>, %41, %cst_20 [1] : vector<4x2x128xf32> to vector<4x128xf32>
    %43 = vector.shape_cast %42 : vector<4x128xf32> to vector<4x1x128xf32>
    %44 = arith.addf %40, %43 : vector<4x1x128xf32>
    %c0_21 = arith.constant 0 : index
    %c0_22 = arith.constant 0 : index
    %c0_23 = arith.constant 0 : index
    %45 = vector.load %arg6[%c0_21, %c0_22, %c0_23] : memref<4x1x128xf32, #tpu.memory_space<vmem>>, vector<4x1x128xf32>
    tpu.vector_store %arg6[%c0_21, %c0_22, %c0_23], %44 {strides = array<i32>} : memref<4x1x128xf32, #tpu.memory_space<vmem>>, vector<4x1x128xf32>,
    %c0_24 = arith.constant 0 : index
    %c0_25 = arith.constant 0 : index
    %c0_26 = arith.constant 0 : index
    %46 = vector.load %arg7[%c0_24, %c0_25, %c0_26] : memref<4x1x128xf32, #tpu.memory_space<vmem>>, vector<4x1x128xf32>
    %cst_27 = arith.constant dense<0.000000e+00> : vector<4x128xf32>
    %47 = vector.multi_reduction <add>, %33, %cst_27 [1] : vector<4x2x128xf32> to vector<4x128xf32>
    %48 = vector.shape_cast %47 : vector<4x128xf32> to vector<4x1x128xf32>
    %49 = arith.addf %46, %48 : vector<4x1x128xf32>
    %c0_28 = arith.constant 0 : index
    %c0_29 = arith.constant 0 : index
    %c0_30 = arith.constant 0 : index
    %50 = vector.load %arg7[%c0_28, %c0_29, %c0_30] : memref<4x1x128xf32, #tpu.memory_space<vmem>>, vector<4x1x128xf32>
    tpu.vector_store %arg7[%c0_28, %c0_29, %c0_30], %49 {strides = array<i32>} : memref<4x1x128xf32, #tpu.memory_space<vmem>>, vector<4x1x128xf32>,
    %c0_i32_31 = arith.constant 0 : i32
    %51 = arith.cmpi eq, %arg1, %c0_i32_31 : i32
    %52 = arith.extui %51 : i1 to i32
    %c0_i32_32 = arith.constant 0 : i32
    %53 = arith.cmpi ne, %52, %c0_i32_32 : i32
    scf.if %53 {
      %c0_33 = arith.constant 0 : index
      %c0_34 = arith.constant 0 : index
      %c0_35 = arith.constant 0 : index
      %54 = vector.load %arg5[%c0_33, %c0_34, %c0_35] : memref<4x1x128xf32, #tpu.memory_space<vmem>>, vector<4x1x128xf32>
      %cst_36 = arith.constant dense<0.000000e+00> : vector<4x1xf32>
      %55 = vector.multi_reduction <add>, %54, %cst_36 [2] : vector<4x1x128xf32> to vector<4x1xf32>
      %c0_37 = arith.constant 0 : index
      %c0_38 = arith.constant 0 : index
      %c0_39 = arith.constant 0 : index
      %56 = vector.load %arg4[%c0_37, %c0_38, %c0_39] : memref<1x4x3xf32, #tpu.memory_space<vmem>>, vector<1x4x1xf32>
      %57 = vector.shape_cast %56 : vector<1x4x1xf32> to vector<4x1xf32>
      %58 = vector.shape_cast %55 : vector<4x1xf32> to vector<1x4x1xf32>
      tpu.vector_store %arg4[%c0_37, %c0_38, %c0_39], %58 {strides = array<i32>} : memref<1x4x3xf32, #tpu.memory_space<vmem>>, vector<1x4x1xf32>,
      %c0_40 = arith.constant 0 : index
      %c0_41 = arith.constant 0 : index
      %c0_42 = arith.constant 0 : index
      %59 = vector.load %arg6[%c0_40, %c0_41, %c0_42] : memref<4x1x128xf32, #tpu.memory_space<vmem>>, vector<4x1x128xf32>
      %cst_43 = arith.constant dense<0.000000e+00> : vector<4x1xf32>
      %60 = vector.multi_reduction <add>, %59, %cst_43 [2] : vector<4x1x128xf32> to vector<4x1xf32>
      %c0_44 = arith.constant 0 : index
      %c0_45 = arith.constant 0 : index
      %c1 = arith.constant 1 : index
      %61 = vector.load %arg4[%c0_44, %c0_45, %c1] : memref<1x4x3xf32, #tpu.memory_space<vmem>>, vector<1x4x1xf32>
      %62 = vector.shape_cast %61 : vector<1x4x1xf32> to vector<4x1xf32>
      %63 = vector.shape_cast %60 : vector<4x1xf32> to vector<1x4x1xf32>
      tpu.vector_store %arg4[%c0_44, %c0_45, %c1], %63 {strides = array<i32>} : memref<1x4x3xf32, #tpu.memory_space<vmem>>, vector<1x4x1xf32>,
      %c0_46 = arith.constant 0 : index
      %c0_47 = arith.constant 0 : index
      %c0_48 = arith.constant 0 : index
      %64 = vector.load %arg7[%c0_46, %c0_47, %c0_48] : memref<4x1x128xf32, #tpu.memory_space<vmem>>, vector<4x1x128xf32>
      %cst_49 = arith.constant dense<0.000000e+00> : vector<4x1xf32>
      %65 = vector.multi_reduction <add>, %64, %cst_49 [2] : vector<4x1x128xf32> to vector<4x1xf32>
      %c0_50 = arith.constant 0 : index
      %c0_51 = arith.constant 0 : index
      %c2 = arith.constant 2 : index
      %66 = vector.load %arg4[%c0_50, %c0_51, %c2] : memref<1x4x3xf32, #tpu.memory_space<vmem>>, vector<1x4x1xf32>
      %67 = vector.shape_cast %66 : vector<1x4x1xf32> to vector<4x1xf32>
      %68 = vector.shape_cast %65 : vector<4x1xf32> to vector<1x4x1xf32>
      tpu.vector_store %arg4[%c0_50, %c0_51, %c2], %68 {strides = array<i32>} : memref<1x4x3xf32, #tpu.memory_space<vmem>>, vector<1x4x1xf32>,
    } else {
    }
    return
  }
  func.func @transform_0(%arg0: i32, %arg1: i32) -> (i32, i32, i32, i32) {
    %c0_i32 = arith.constant 0 : i32
    %c0_i32_0 = arith.constant 0 : i32
    %c0_i32_1 = arith.constant 0 : i32
    return %arg0, %c0_i32, %arg1, %c0_i32_0 : i32, i32, i32, i32
  }
  func.func @transform_1(%arg0: i32, %arg1: i32) -> (i32, i32, i32, i32) {
    %c0_i32 = arith.constant 0 : i32
    %c0_i32_0 = arith.constant 0 : i32
    %c0_i32_1 = arith.constant 0 : i32
    return %arg0, %c0_i32, %arg1, %c0_i32_0 : i32, i32, i32, i32
  }
  func.func @transform_2(%arg0: i32, %arg1: i32) -> (i32, i32, i32) {
    %c0_i32 = arith.constant 0 : i32
    %c0_i32_0 = arith.constant 0 : i32
    %c0_i32_1 = arith.constant 0 : i32
    return %arg0, %c0_i32, %c0_i32_0 : i32, i32, i32
  }
}

</mosaic_0001>

<bundles_post_ra>
// kernel: dice_loss.1
= control target key start
LH: loop header
LB: loop body
LE: loop exit
PB: predicated region body
PF: predicated region fallthrough
CT: control target
= control target key end

     0   :  { %s653_s9 = smov 0   ;;  %s655_s10 = smov 0   ;;  %s752_s0 = inlined_call_operand.vmem [shape: f32[2,4,2,128], index: 0, kind: input, shape index: {}]   ;;  %s753_s1 = inlined_call_operand.vmem [shape: s32[2,1,2,128], index: 1, kind: input, shape index: {}]   ;;  %s754_s2 = inlined_call_operand.vmem [shape: f32[2,4,3], index: 2, kind: output, shape index: {}]  }
   0x1   :  { %s657_s11 = smov 0  }
   0x2 LB: > { %s24_s12 = sadd.s32 1, %s631_s10  ;;  %p566_p0 = scmp.ge.s32.totalorder %s635_s11, 1  ;;  %s635_s11 = sphi %s657_s11, %s12_s11   ;;  %s631_s10 = sphi %s655_s10, %s756_s10   ;;  %s627_s9 = sphi %s653_s9, %s755_s9  }
   0x3   : > { %p26_p1 = scmp.ge.s32.totalorder %s24_s12, 2  ;;  %p143_p2 = scmp.lt.s32.totalorder %s635_s11, 3 }
   0x5   : > { %s758_s12 = smov (%p26_p1, %s24_s12), 0  ;;  %p144_p3 = pnand %p566_p0, %p143_p2 }
   0x6   : > { %p174_p4 = scmp.lt.s32.totalorder (!%p144_p3), %s627_s9, 1 }
   0x7   : > { %147 = sbr.rel (%p144_p3) target bundleno = 251 (0xfb), region = 28 }
   0xc   : > { %v637_v0 = vmov 0.0   ;;  %s760_s9 = smov (!%p174_p4, %s627_s9), 1  ;;  %vm213_vm0 = vcmask 1041408   ;;  %vm393_vm5 = vcmask 1040384   ;;  %vm411_vm6 = vcmask 1041409  }
   0xd   : > { %207 = vst [vmem:[#allocation4 + $0x2] sm:$0x1] %v637_v0  ;;  %197 = vst [vmem:[#allocation2] sm:$0x1] %v637_v0  ;;  %s569_s13 = sshll.u32 %s760_s9, 1  ;;  %s577_s14 = sshll.u32 %s760_s9, 3 }
   0xe   : > { %198 = vst [vmem:[#allocation2 + $0x1] sm:$0x1] %v637_v0  ;;  %199 = vst [vmem:[#allocation2 + $0x2] sm:$0x1] %v637_v0  ;;  %s188_s17 = scalar_lea.vmem %s753_s1, %s569_s13  ;;  %s181_s20 = scalar_lea.vmem %s752_s0, %s577_s14  ;;  %vm414_vm7 = vcmask 1042434   ;;  %vm417_vm8 = vcmask 1043459  }
   0xf   : > { %200 = vst [vmem:[#allocation2 + $0x3] sm:$0x1] %v637_v0  ;;  %201 = vst [vmem:[#allocation3] sm:$0x1] %v637_v0  ;;  %v245_v1 = vld [vmem:[%s188_s17] sm:$0x3] }
  0x10   : > { %202 = vst [vmem:[#allocation3 + $0x1] sm:$0x1] %v637_v0  ;;  %203 = vst [vmem:[#allocation3 + $0x2] sm:$0x1] %v637_v0  ;;  %v209_v2 = vld [vmem:[%s181_s20] sm:$0x3] }
  0x11   : > { %204 = vst [vmem:[#allocation3 + $0x3] sm:$0x1] %v637_v0  ;;  %205 = vst [vmem:[#allocation4] sm:$0x1] %v637_v0  ;;  %v210_v3 = vld [vmem:[%s181_s20 + $0x2] sm:$0x3] }
  0x12   : > { %206 = vst [vmem:[#allocation4 + $0x1] sm:$0x1] %v637_v0  ;;  %208 = vst [vmem:[#allocation4 + $0x3] sm:$0x1] %v637_v0  ;;  %vm252_vm1 = vcmp.eq.s32.totalorder %v245_v1, 2  ;;  %v214_v6 = vsel %vm213_vm0, %v209_v2, -inf }
  0x13   : > { %v211_v4 = vld [vmem:[%s181_s20 + $0x4] sm:$0x3]  ;;  %v212_v5 = vld [vmem:[%s181_s20 + $0x6] sm:$0x3]  ;;  %v683_v7 = vsel %vm252_vm1, 1.0, %v637_v0  ;;  %v215_v8 = vsel %vm213_vm0, %v210_v3, -inf }
  0x14   : > { %v216_v9 = vsel %vm213_vm0, %v211_v4, -inf  ;;  %v217_v10 = vsel %vm213_vm0, %v212_v5, -inf  ;;  %v364_v11 = vsel %vm213_vm0, %v683_v7, 0.0  ;;  %v218_v12 = vmax.f32 %v214_v6, %v215_v8  ;;  %v348_v40 = vld [vmem:[#allocation4 + $0x2] sm:$0x1]  ;;  %s570_s21 = sshll.u32 %s760_s9, 2 }
  0x15   : > { %v219_v13 = vmax.f32 %v216_v9, %v217_v10  ;;  %vm249_vm2 = vcmp.eq.s32.totalorder %v245_v1, 1  ;;  %v365_v14 = vrot.slane %v364_v11, 4  ;;  %vm246_vm3 = vcmp.eq.s32.totalorder %v245_v1, 0  ;;  %s192_s24 = scalar_lea.vmem %s754_s2, %s570_s21 }
  0x16   : > { %v690_v15 = vsel %vm249_vm2, 1.0, %v637_v0  ;;  %vm255_vm4 = vcmp.eq.s32.totalorder %v245_v1, 3  ;;  %v694_v20 = vsel %vm246_vm3, 1.0, %v637_v0  ;;  %vm420_vm9 = vcmask 3072  }
  0x17   : > { %v220_v16 = vmax.f32 %v218_v12, %v219_v13  ;;  %v357_v17 = vsel %vm213_vm0, %v690_v15, 0.0  ;;  %v366_v18 = vadd.f32 %v365_v14, %v364_v11  ;;  %v696_v27 = vsel %vm255_vm4, 1.0, %v637_v0 }
  0x18   : > { %v358_v19 = vrot.slane %v357_v17, 4  ;;  %v350_v28 = vsel %vm213_vm0, %v694_v20, 0.0  ;;  %v371_v36 = vsel %vm213_vm0, %v696_v27, 0.0  ;;  %v346_v53 = vld [vmem:[#allocation4] sm:$0x1]  ;;  %vm449_vm10 = vcmask 11272  }
  0x19   : > { %v221_v21 = vsub.f32 %v209_v2, %v220_v16  ;;  %v222_v22 = vsub.f32 %v210_v3, %v220_v16  ;;  %v223_v23 = vsub.f32 %v211_v4, %v220_v16  ;;  %v224_v24 = vsub.f32 %v212_v5, %v220_v16  ;;  %v347_v45 = vld [vmem:[#allocation4 + $0x1] sm:$0x1]  ;;  %v349_v58 = vld [vmem:[#allocation4 + $0x3] sm:$0x1] }
  0x1a   : > { %v367_v25 = vrot.slane %v366_v18, 2  ;;  %v359_v26 = vadd.f32 %v358_v19, %v357_v17  ;;  %v351_v35 = vrot.slane %v350_v28, 4  ;;  %v372_v41 = vrot.slane %v371_v36, 4 }
  0x1b   : > { %v225_v29 = vmul.f32 1.442695, %v221_v21  ;;  %v227_v30 = vmul.f32 1.442695, %v222_v22  ;;  %v229_v31 = vmul.f32 1.442695, %v223_v23 }
  0x1c   : > { %v368_v32 = vadd.f32 %v367_v25, %v366_v18  ;;  %v231_v33 = vmul.f32 1.442695, %v224_v24  ;;  %v360_v34 = vrot.slane %v359_v26, 2  ;;  %v352_v39 = vadd.f32 %v351_v35, %v350_v28 }
  0x1d   : > { %603 = vpow2.f32 %v225_v29  ;;  %v373_v46 = vadd.f32 %v372_v41, %v371_v36  ;;  %vm478_vm11 = vcmask 19472  }
  0x1e   : > { %v369_v37 = vrot.slane %v368_v32, 1  ;;  %605 = vpow2.f32 %v227_v30  ;;  %v361_v38 = vadd.f32 %v360_v34, %v359_v26  ;;  %v353_v44 = vrot.slane %v352_v39, 2 }
  0x1f   : > { %607 = vpow2.f32 %v229_v31  ;;  %v374_v50 = vrot.slane %v373_v46, 2 }
  0x20   : > { %v370_v42 = vadd.f32 %v369_v37, %v368_v32  ;;  %609 = vpow2.f32 %v231_v33  ;;  %v362_v43 = vrot.slane %v361_v38, 1  ;;  %v354_v49 = vadd.f32 %v353_v44, %v352_v39 }
  0x21   : > { %v375_v54 = vadd.f32 %v374_v50, %v373_v46 }
  0x22   : > { %v380_v47 = vadd.f32 %v370_v42, %v348_v40  ;;  %v363_v48 = vadd.f32 %v362_v43, %v361_v38  ;;  %v355_v52 = vrot.slane %v354_v49, 1 }
  0x23   : > { %v376_v56 = vrot.slane %v375_v54, 1 }
  0x24   : > { %384 = vst [vmem:[#allocation4 + $0x2] sm:$0x1] %v380_v47  ;;  %v379_v51 = vadd.f32 %v363_v48, %v347_v45  ;;  %v356_v55 = vadd.f32 %v355_v52, %v354_v49 }
  0x25   : > { %v377_v59 = vadd.f32 %v376_v56, %v375_v54 }
  0x26   : > { %383 = vst [vmem:[#allocation4 + $0x1] sm:$0x1] %v379_v51  ;;  %v378_v57 = vadd.f32 %v356_v55, %v346_v53 }
  0x27   : > { %v381_v0 = vadd.f32 %v377_v59, %v349_v58 }
  0x28   : > { %382 = vst [vmem:[#allocation4] sm:$0x1] %v378_v57 }
  0x29   : > { %385 = vst [vmem:[#allocation4 + $0x3] sm:$0x1] %v381_v0 }
  0x2a   : > { %v604_v60 = vpop.eup %603 }
  0x2b   : > { %v606_v61 = vpop.eup %605  ;;  %v453_v62 = vld [vmem:[#allocation4 + $0x2] sm:$0x1]  ;;  %v233_v63 = vsel %vm213_vm0, %v604_v60, 0.0 }
  0x2c   : > { %v608_v1 = vpop.eup %607  ;;  %v461_v2 = vsel %vm393_vm5, %v453_v62, 0.0  ;;  %v234_v3 = vsel %vm213_vm0, %v606_v61, 0.0 }
  0x2d   : > { %v610_v4 = vpop.eup %609  ;;  %462 = vadd.xlane.f32.xlu1 %v461_v2  ;;  %v235_v5 = vadd.f32 %v234_v3, %v233_v63  ;;  %v236_v6 = vsel %vm213_vm0, %v608_v1, 0.0  ;;  %v452_v8 = vld [vmem:[#allocation4 + $0x1] sm:$0x1]  ;;  %v259_v2 = vld [vmem:[#allocation2 + $0x1] sm:$0x1] }
  0x2e   : > { %v238_v9 = vsel %vm213_vm0, %v610_v4, 0.0  ;;  %v458_v10 = vsel %vm393_vm5, %v452_v8, 0.0  ;;  %v260_v3 = vld [vmem:[#allocation2 + $0x2] sm:$0x1] }
  0x2f   : > { %v237_v11 = vadd.f32 %v236_v6, %v235_v5  ;;  %459 = vadd.xlane.f32.xlu0 %v458_v10 }
  0x31   : > { %v239_v12 = vadd.f32 %v238_v9, %v237_v11 }
  0x33   : > { %611 = vrcp.f32 %v239_v12 }
  0x40   : > { %v612_v13 = vpop.eup %611 }
  0x41   : > { %v243_v14 = vmul.f32 %v612_v13, %v608_v1  ;;  %v242_v16 = vmul.f32 %v612_v13, %v606_v61  ;;  %v241_v17 = vmul.f32 %v612_v13, %v604_v60  ;;  %v244_v18 = vmul.f32 %v612_v13, %v610_v4  ;;  %v303_v61 = vld [vmem:[#allocation3 + $0x1] sm:$0x1]  ;;  %v258_v4 = vld [vmem:[#allocation2] sm:$0x1] }
  0x43   : > { %v264_v19 = vmul.f32 %v683_v7, %v243_v14  ;;  %v263_v21 = vmul.f32 %v690_v15, %v242_v16  ;;  %v307_v22 = vmul.f32 %v242_v16, %v242_v16  ;;  %v262_v23 = vmul.f32 %v694_v20, %v241_v17 }
  0x44   : > { %v265_v24 = vmul.f32 %v696_v27, %v244_v18  ;;  %v308_v25 = vmul.f32 %v243_v14, %v243_v14  ;;  %v309_v26 = vmul.f32 %v244_v18, %v244_v18  ;;  %v306_v28 = vmul.f32 %v241_v17, %v241_v17  ;;  %v261_v14 = vld [vmem:[#allocation2 + $0x3] sm:$0x1] }
  0x45   : > { %v317_v29 = vsel %vm213_vm0, %v307_v22, 0.0  ;;  %v273_v30 = vsel %vm213_vm0, %v263_v21, 0.0  ;;  %v280_v31 = vsel %vm213_vm0, %v264_v19, 0.0  ;;  %v266_v32 = vsel %vm213_vm0, %v262_v23, 0.0 }
  0x46   : > { %v318_v33 = vrot.slane %v317_v29, 4  ;;  %v274_v7 = vrot.slane %v273_v30, 4  ;;  %v281_v34 = vrot.slane %v280_v31, 4  ;;  %v267_v15 = vrot.slane %v266_v32, 4 }
  0x47   : > { %v287_v35 = vsel %vm213_vm0, %v265_v24, 0.0  ;;  %v324_v20 = vsel %vm213_vm0, %v308_v25, 0.0  ;;  %v331_v27 = vsel %vm213_vm0, %v309_v26, 0.0  ;;  %v310_v36 = vsel %vm213_vm0, %v306_v28, 0.0  ;;  %v304_v25 = vld [vmem:[#allocation3 + $0x2] sm:$0x1] }
  0x48   : > { %v319_v37 = vadd.f32 %v318_v33, %v317_v29  ;;  %v275_v38 = vadd.f32 %v274_v7, %v273_v30  ;;  %v282_v39 = vadd.f32 %v281_v34, %v280_v31  ;;  %v268_v40 = vadd.f32 %v267_v15, %v266_v32  ;;  %v305_v26 = vld [vmem:[#allocation3 + $0x3] sm:$0x1]  ;;  %v302_v28 = vld [vmem:[#allocation3] sm:$0x1] }
  0x49   : > { %v288_v41 = vrot.slane %v287_v35, 4  ;;  %v325_v42 = vrot.slane %v324_v20, 4  ;;  %v332_v43 = vrot.slane %v331_v27, 4  ;;  %v311_v44 = vrot.slane %v310_v36, 4 }
  0x4a   : > { %v320_v45 = vrot.slane %v319_v37, 2  ;;  %v276_v46 = vrot.slane %v275_v38, 2  ;;  %v283_v47 = vrot.slane %v282_v39, 2  ;;  %v269_v48 = vrot.slane %v268_v40, 2 }
  0x4b   : > { %v289_v49 = vadd.f32 %v288_v41, %v287_v35  ;;  %v326_v50 = vadd.f32 %v325_v42, %v324_v20  ;;  %v333_v51 = vadd.f32 %v332_v43, %v331_v27  ;;  %v312_v52 = vadd.f32 %v311_v44, %v310_v36 }
  0x4c   : > { %v321_v53 = vadd.f32 %v320_v45, %v319_v37  ;;  %v277_v54 = vadd.f32 %v276_v46, %v275_v38  ;;  %v284_v55 = vadd.f32 %v283_v47, %v282_v39  ;;  %v270_v56 = vadd.f32 %v269_v48, %v268_v40 }
  0x4d   : > { %v290_v57 = vrot.slane %v289_v49, 2  ;;  %v327_v58 = vrot.slane %v326_v50, 2  ;;  %v334_v59 = vrot.slane %v333_v51, 2  ;;  %v313_v60 = vrot.slane %v312_v52, 2 }
  0x4e   : > { %v322_v62 = vrot.slane %v321_v53, 1  ;;  %v278_v63 = vrot.slane %v277_v54, 1  ;;  %v285_v0 = vrot.slane %v284_v55, 1  ;;  %v271_v1 = vrot.slane %v270_v56, 1 }
  0x4f   : > { %v291_v5 = vadd.f32 %v290_v57, %v289_v49  ;;  %v328_v6 = vadd.f32 %v327_v58, %v326_v50  ;;  %v335_v8 = vadd.f32 %v334_v59, %v333_v51  ;;  %v314_v9 = vadd.f32 %v313_v60, %v312_v52  ;;  %v451_v49 = vld [vmem:[#allocation4] sm:$0x1]  ;;  %v454_v50 = vld [vmem:[#allocation4 + $0x3] sm:$0x1] }
  0x50   : > { %v323_v10 = vadd.f32 %v322_v62, %v321_v53  ;;  %v279_v11 = vadd.f32 %v278_v63, %v277_v54  ;;  %v286_v12 = vadd.f32 %v285_v0, %v284_v55  ;;  %v272_v13 = vadd.f32 %v271_v1, %v270_v56 }
  0x51   : > { %v292_v16 = vrot.slane %v291_v5, 1  ;;  %v329_v17 = vrot.slane %v328_v6, 1  ;;  %v336_v18 = vrot.slane %v335_v8, 1  ;;  %v315_v19 = vrot.slane %v314_v9, 1 }
  0x52   : > { %v339_v21 = vadd.f32 %v323_v10, %v303_v61  ;;  %v295_v22 = vadd.f32 %v279_v11, %v259_v2  ;;  %v296_v23 = vadd.f32 %v286_v12, %v260_v3  ;;  %v294_v24 = vadd.f32 %v272_v13, %v258_v4 }
  0x53   : > { %v293_v29 = vadd.f32 %v292_v16, %v291_v5  ;;  %v330_v30 = vadd.f32 %v329_v17, %v328_v6  ;;  %v337_v31 = vadd.f32 %v336_v18, %v335_v8  ;;  %v316_v32 = vadd.f32 %v315_v19, %v314_v9 }
  0x54   : > { %343 = vst [vmem:[#allocation3 + $0x1] sm:$0x1] %v339_v21  ;;  %299 = vst [vmem:[#allocation2 + $0x1] sm:$0x1] %v295_v22  ;;  %v455_v51 = vsel %vm393_vm5, %v451_v49, 0.0  ;;  %v464_v52 = vsel %vm393_vm5, %v454_v50, 0.0 }
  0x55   : > { %300 = vst [vmem:[#allocation2 + $0x2] sm:$0x1] %v296_v23  ;;  %298 = vst [vmem:[#allocation2] sm:$0x1] %v294_v24  ;;  %v297_v33 = vadd.f32 %v293_v29, %v261_v14  ;;  %v340_v7 = vadd.f32 %v330_v30, %v304_v25  ;;  %v341_v34 = vadd.f32 %v337_v31, %v305_v26 }
  0x56   : > { %v338_v15 = vadd.f32 %v316_v32, %v302_v28 }
  0x57   : > { %301 = vst [vmem:[#allocation2 + $0x3] sm:$0x1] %v297_v33  ;;  %344 = vst [vmem:[#allocation3 + $0x2] sm:$0x1] %v340_v7 }
  0x58   : > { %345 = vst [vmem:[#allocation3 + $0x3] sm:$0x1] %v341_v34  ;;  %342 = vst [vmem:[#allocation3] sm:$0x1] %v338_v15 }
  0x5b   : > { %v423_v35 = vld [vmem:[#allocation3 + $0x1] sm:$0x1]  ;;  %v390_v20 = vld [vmem:[#allocation2 + $0x1] sm:$0x1] }
  0x5c   : > { %v391_v27 = vld [vmem:[#allocation2 + $0x2] sm:$0x1]  ;;  %v429_v36 = vsel %vm393_vm5, %v423_v35, 0.0  ;;  %v397_v37 = vsel %vm393_vm5, %v390_v20, 0.0  ;;  %v389_v38 = vld [vmem:[#allocation2] sm:$0x1] }
  0x5d   : > { %430 = vadd.xlane.f32.xlu1 %v429_v36  ;;  %398 = vadd.xlane.f32.xlu0 %v397_v37  ;;  %v400_v39 = vsel %vm393_vm5, %v391_v27, 0.0  ;;  %v394_v40 = vsel %vm393_vm5, %v389_v38, 0.0 }
  0x5e   : > { %v392_v41 = vld [vmem:[#allocation2 + $0x3] sm:$0x1]  ;;  %v424_v42 = vld [vmem:[#allocation3 + $0x2] sm:$0x1] }
  0x5f   : > { %v403_v43 = vsel %vm393_vm5, %v392_v41, 0.0  ;;  %v432_v44 = vsel %vm393_vm5, %v424_v42, 0.0  ;;  %v425_v45 = vld [vmem:[#allocation3 + $0x3] sm:$0x1]  ;;  %v422_v46 = vld [vmem:[#allocation3] sm:$0x1] }
  0x60   : > { %v435_v47 = vsel %vm393_vm5, %v425_v45, 0.0  ;;  %v426_v48 = vsel %vm393_vm5, %v422_v46, 0.0 }
  0x61   : > { %401 = vadd.xlane.f32.xlu0 %v400_v39  ;;  %395 = vadd.xlane.f32.xlu1 %v394_v40 }
  0x65   : > { %404 = vadd.xlane.f32.xlu0 %v403_v43  ;;  %433 = vadd.xlane.f32.xlu1 %v432_v44 }
  0x69   : > { %436 = vadd.xlane.f32.xlu0 %v435_v47  ;;  %427 = vadd.xlane.f32.xlu1 %v426_v48 }
  0x6d   : > { %456 = vadd.xlane.f32.xlu0 %v455_v51  ;;  %465 = vadd.xlane.f32.xlu1 %v464_v52 }
  0xb6   : > { %v463_v53 = vpop.xlane.xlu1 %462 }
  0xb7   : > { %v473_v13 = vrot.slane %v463_v53, 6 }
  0xb8   : > { %v460_v54 = vpop.xlane.xlu0 %459 }
  0xb9   : > { %v471_v11 = vrot.slane %v460_v54, 7 }
  0xe6   : > { %v431_v55 = vpop.xlane.xlu1 %430  ;;  %v399_v56 = vpop.xlane.xlu0 %398 }
  0xe7   : > { %v410_v59 = vrot.slane %v399_v56, 7  ;;  %v442_v2 = vrot.slane %v431_v55, 7 }
  0xea   : > { %v402_v57 = vpop.xlane.xlu0 %401  ;;  %v396_v58 = vpop.xlane.xlu1 %395 }
  0xeb   : > { %v413_v60 = vrot.slane %v402_v57, 6  ;;  %v412_v61 = vsel %vm411_vm6, %v410_v59, %v396_v58 }
  0xed   : > { %v415_v1 = vsel %vm414_vm7, %v413_v60, %v412_v61 }
  0xee   : > { %v405_v62 = vpop.xlane.xlu0 %404  ;;  %v434_v63 = vpop.xlane.xlu1 %433 }
  0xef   : > { %v416_v0 = vrot.slane %v405_v62, 5  ;;  %v444_v4 = vrot.slane %v434_v63, 6 }
  0xf1   : > { %v418_v3 = vsel %vm417_vm8, %v416_v0, %v415_v1 }
  0xf2   : > { %421 = vst.msk [vmem:[%s192_s24] sm:$0xf] %vm420_vm9, %v418_v3  ;;  %v437_v5 = vpop.xlane.xlu0 %436  ;;  %v428_v6 = vpop.xlane.xlu1 %427 }
  0xf3   : > { %v446_v8 = vrot.slane %v437_v5, 5  ;;  %v443_v9 = vsel %vm411_vm6, %v442_v2, %v428_v6 }
  0xf4   : > { %v445_v10 = vsel %vm414_vm7, %v444_v4, %v443_v9 }
  0xf5   : > { %v447_v12 = vsel %vm417_vm8, %v446_v8, %v445_v10 }
  0xf6   : > { %450 = vst.msk [vmem:[%s192_s24] sm:$0xf] %vm449_vm10, %v447_v12  ;;  %v457_v14 = vpop.xlane.xlu0 %456  ;;  %v466_v16 = vpop.xlane.xlu1 %465 }
  0xf7   : > { %v472_v17 = vsel %vm411_vm6, %v471_v11, %v457_v14  ;;  %v475_v18 = vrot.slane %v466_v16, 5 }
  0xf8   : > { %v474_v19 = vsel %vm414_vm7, %v473_v13, %v472_v17 }
  0xf9   : > { %v476_v21 = vsel %vm417_vm8, %v475_v18, %v474_v19 }
  0xfa   : > { %479 = vst.msk [vmem:[%s192_s24] sm:$0xf] %vm478_vm11, %v476_v21 }
  0xfb PF: > { %s12_s11 = sadd.s32 1, %s635_s11   ;;  %s755_s9 = smov %s631_s10 }
  0xfc   : > { %p9_p5 = scmp.ge.s32.totalorder %s12_s11, 4   ;;  %s756_s10 = smov %s758_s12 }
  0xfe   :  { %11 = sbr.rel (!%p9_p5) target bundleno = 2 (0x2), region = 69 }

</bundles_post_ra>
